<compile_context>
chip_gen: v5e
topology: v5e:2x2
jax: 0.10.0
libtpu: 0.0.40
codegen_flags: <defaults>
</compile_context>

<pallas_src>
import numpy as np
import jax
import jax.numpy as jnp
from jax.experimental import pallas as pl
from jax.experimental.pallas import tpu as pltpu


# --------------------------------------------------------------------------- #
# Kernel: entire GNNCritic4 forward for one graph per grid step, fully fused.
# --------------------------------------------------------------------------- #
def _gnn_critic4_kernel(adj_ref, state_ref, act_ref,
                        wg_ref, bg_ref,
                        w1x_ref, w1a_ref, b1_ref,
                        w2_ref, b2_ref,
                        w3r_ref, b3_ref,
                        out_ref):
    # One graph per grid step: drop the leading block dim of size 1.
    x = state_ref[0]                                    # (A, C)  f32
    adj = adj_ref[0]                                    # (A, A)  f32
    act = act_ref[0]                                    # (A, A1) f32
    wg = wg_ref[...]                                    # (C, C)  f32

    # --- GCNConv weight matmul: X @ Wg as C rank-1 VPU FMAs (C is tiny, a
    #     C-deep MXU pass would be almost empty; VPU slots are idle here). ---
    c = wg.shape[0]
    xw = x[:, 0:1] * wg[0:1, :]
    for k in range(1, c):                               # static unroll
        xw = xw + x[:, k:k+1] * wg[k:k+1, :]            # (A, C) f32

    # --- message passing: block-diagonal A_hat, bf16 MXU operands, f32 acc ---
    h = jnp.dot(adj.astype(jnp.bfloat16), xw.astype(jnp.bfloat16),
                preferred_element_type=jnp.float32)     # (A, C)
    h = jnp.maximum(h + bg_ref[...], 0.0)               # f32 VPU

    # --- residual ---
    x = h + x                                           # (A, C) f32

    # --- lin1(concat([x, action])) = x @ W1x + action @ W1a + b1 ; ReLU ---
    z = (jnp.dot(x.astype(jnp.bfloat16), w1x_ref[...],
                 preferred_element_type=jnp.float32)
         + jnp.dot(act.astype(jnp.bfloat16), w1a_ref[...],
                   preferred_element_type=jnp.float32)
         + b1_ref[...])
    z = jnp.maximum(z, 0.0)                             # (A, H) f32

    # --- lin2 + ReLU ---
    z = jnp.dot(z.astype(jnp.bfloat16), w2_ref[...],
                preferred_element_type=jnp.float32) + b2_ref[...]
    z = jnp.maximum(z, 0.0)                             # (A, H) f32

    # --- readout over the act_dim nodes of this graph: sublane reduce (XLU) ---
    zb = jnp.sum(z, axis=0, keepdims=True)              # (1, H) f32

    # --- lin3 (H -> 1): VPU multiply + lane reduce (keeps the MXU free) ---
    q = jnp.sum(zb * w3r_ref[...], axis=-1, keepdims=True) + b3_ref[...]  # (1,1)

    # --- lane-dense store: broadcast the scalar across 128 lanes ---
    out_ref[...] = jnp.broadcast_to(q.reshape(1, 1, 1), out_ref.shape)


# --------------------------------------------------------------------------- #
# Host-side helpers.
# --------------------------------------------------------------------------- #
def _linear_init(key, fan_in, shape):
    bound = float(fan_in) ** -0.5
    return jax.random.uniform(key, shape, jnp.float32, -bound, bound)


class GNNCritic4Pallas:
    """JAX/Pallas port of GNNCritic4 (GNN, Concatenation, FC, Readout)."""

    def __init__(self, in_channels, hidden_size=32, act_dim=6, mode=1,
                 key=jax.random.PRNGKey(0)):
        self.in_channels = in_channels
        self.hidden_size = hidden_size
        self.act_dim = act_dim
        self.mode = mode
        C, H, A1 = in_channels, hidden_size, mode + 1
        ks = jax.random.split(key, 9)
        self.params = {
            "wg":  _linear_init(ks[0], C, (C, C)),
            "bg":  _linear_init(ks[1], C, (1, C)),
            "w1x": _linear_init(ks[2], C + A1, (C, H)),
            "w1a": _linear_init(ks[3], C + A1, (A1, H)),
            "b1":  _linear_init(ks[4], C + A1, (1, H)),
            "w2":  _linear_init(ks[5], H, (H, H)),
            "b2":  _linear_init(ks[6], H, (1, H)),
            "w3":  _linear_init(ks[7], H, (H, 1)),
            "b3":  _linear_init(ks[8], H, (1, 1)),
        }
        p = self.params
        # bf16 copies of the MXU-path weights (halves DMA bytes; accumulation
        # stays f32 in-kernel).  VPU-path weights (wg, w3) stay f32.
        self._wb = {
            "w1x": p["w1x"].astype(jnp.bfloat16),
            "w1a": p["w1a"].astype(jnp.bfloat16),
            "w2":  p["w2"].astype(jnp.bfloat16),
        }
        self._w3row = p["w3"].T                          # (1, H) f32, VPU path
        self._adj_cache = {}

    # ---- adjacency (host-side, cached) ------------------------------------ #
    @staticmethod
    def _norm_adj_dense(edge_index, num_nodes):
        ei = np.asarray(edge_index)
        src, dst = ei[0], ei[1]
        adj = np.zeros((num_nodes, num_nodes), np.float32)
        np.add.at(adj, (dst, src), 1.0)                  # message src -> dst
        adj += np.eye(num_nodes, dtype=np.float32)       # self loops
        deg = adj.sum(axis=1)
        dis = np.where(deg > 0.0, 1.0 / np.sqrt(deg), 0.0).astype(np.float32)
        return adj * dis[:, None] * dis[None, :]

    def _adj_blocks(self, edge_index, num_nodes):
        """(B, act_dim, act_dim) normalized adjacency blocks, cached on host."""
        ei = np.asarray(edge_index)
        key = (ei.tobytes(), int(num_nodes), self.act_dim)
        if key in self._adj_cache:
            return self._adj_cache[key]
        # TODO(synk): the sparse edge_index scatter (GCN message passing) is
        # built densely on the host; a true sparse gather/scatter has no clean
        # Pallas path.  Cross-graph edges would need the dense-adjacency path.
        if np.any(ei[0] // self.act_dim != ei[1] // self.act_dim):
            raise NotImplementedError(
                "cross-graph edges are not supported by the block-diagonal path")
        dense = self._norm_adj_dense(ei, num_nodes)
        A = self.act_dim
        B = num_nodes // A
        blocks = np.stack(
            [dense[b * A:(b + 1) * A, b * A:(b + 1) * A] for b in range(B)])
        blocks = jnp.asarray(blocks, jnp.float32)
        self._adj_cache[key] = blocks
        return blocks

    # ---- fused Pallas forward --------------------------------------------- #
    def __call__(self, state, edge_index, action):
        N, C = state.shape
        A, A1, H = self.act_dim, self.mode + 1, self.hidden_size
        B = N // A
        p, wb = self.params, self._wb

        adj_b = self._adj_blocks(edge_index, N)                      # (B, A, A)
        x_b = state.reshape(B, A, C).astype(jnp.float32)             # (B, A, C)
        a_b = action.reshape(B, A, A1).astype(jnp.float32)           # (B, A, A1)

        inputs = (adj_b, x_b, a_b,
                  p["wg"], p["bg"],
                  wb["w1x"], wb["w1a"], p["b1"],
                  wb["w2"], p["b2"],
                  self._w3row, p["b3"])

        # Weights: full-array blocks with constant index_map -> VMEM-resident.
        def const(shape):
            return pl.BlockSpec(shape, lambda b, _s=len(shape): (0,) * _s)

        in_specs = [
            pl.BlockSpec((1, A, A), lambda b: (b, 0, 0)),    # adj blocks
            pl.BlockSpec((1, A, C), lambda b: (b, 0, 0)),    # state
            pl.BlockSpec((1, A, A1), lambda b: (b, 0, 0)),   # action
            const((C, C)), const((1, C)),                    # wg, bg
            const((C, H)), const((A1, H)), const((1, H)),    # w1x, w1a, b1
            const((H, H)), const((1, H)),                    # w2, b2
            const((1, H)), const((1, 1)),                    # w3 row, b3
        ]
        out_specs = pl.BlockSpec((1, 1, 128), lambda b: (b, 0, 0))

        flops_per_graph = (2 * A * C * C           # X @ Wg
                           + 2 * A * A * C         # A_hat @ (X Wg)
                           + 2 * A * (C + A1) * H  # lin1
                           + 2 * A * H * H         # lin2
                           + A * H + 2 * H)        # readout + lin3
        bytes_accessed = int(sum(int(a.size) * a.dtype.itemsize for a in inputs)
                             + B * 128 * 4)

        out = pl.pallas_call(
            _gnn_critic4_kernel,
            out_shape=jax.ShapeDtypeStruct((B, 1, 128), jnp.float32),
            grid=(B,),
            in_specs=in_specs,
            out_specs=out_specs,
            compiler_params=pltpu.CompilerParams(
                dimension_semantics=("parallel",),      # v7x: shard over 2 TCs
                vmem_limit_bytes=32 * 1024 * 1024),     # safe on v7x's 64 MiB
            cost_estimate=pl.CostEstimate(
                flops=B * flops_per_graph,
                transcendentals=0,
                bytes_accessed=bytes_accessed),
        )(*inputs)
        return out[:, 0, 0]                                          # (B,)

    # Pure-JAX reference mirroring the PyTorch forward, for validation.
    def reference(self, state, edge_index, action):
        p = self.params
        N, C = state.shape
        adj = jnp.asarray(self._norm_adj_dense(edge_index, N))
        hp = jax.lax.Precision.HIGHEST
        h = jnp.maximum(
            jnp.dot(adj, jnp.dot(state, p["wg"], precision=hp), precision=hp)
            + p["bg"], 0.0)
        x = h + state
        x = x.reshape(-1, self.act_dim, C)
        concat = jnp.concatenate([x, action], axis=-1)
        w1 = jnp.concatenate([p["w1x"], p["w1a"]], axis=0)
        z = jnp.maximum(jnp.dot(concat, w1, precision=hp) + p["b1"], 0.0)
        z = jnp.maximum(jnp.dot(z, p["w2"], precision=hp) + p["b2"], 0.0)
        z = z.sum(axis=1)
        q = jnp.dot(z, p["w3"], precision=hp) + p["b3"]
        return q[:, 0]


if __name__ == "__main__":
    B, act_dim, in_channels, hidden, mode = 2, 6, 4, 32, 1
    N = B * act_dim

    key = jax.random.PRNGKey(0)
    k_state, k_action, k_params = jax.random.split(key, 3)

    state = jax.random.normal(k_state, (N, in_channels), jnp.float32)
    action = jax.random.normal(k_action, (B, act_dim, mode + 1), jnp.float32)

    # Deterministic bidirectional ring edges within each graph.
    edges = []
    for b in range(B):
        base = b * act_dim
        for i in range(act_dim):
            j = (i + 1) % act_dim
            edges.append((base + i, base + j))
            edges.append((base + j, base + i))
    edge_index = jnp.asarray(edges, dtype=jnp.int32).T               # (2, E)

    critic = GNNCritic4Pallas(in_channels, hidden, act_dim, mode, k_params)

    q = critic(state, edge_index, action)
    jax.block_until_ready(q)

    q_ref = critic.reference(state, edge_index, action)
    assert q.shape == (B,)
    assert q.dtype == jnp.float32
    # Kernel uses bf16 MXU operands with f32 accumulation; reference uses
    # Precision.HIGHEST f32 — compare with a bf16-appropriate tolerance.
    assert jnp.allclose(q, q_ref, rtol=5e-2, atol=5e-2), (q, q_ref)

    print("KERNEL_OK")
</pallas_src>

<mosaic_0001>
module attributes {stable_mosaic.version = 11 : i64} {
  func.func @_gnn_critic4_kernel(%arg0: i32, %arg1: memref<1x6x6xf32, #tpu.memory_space<vmem>>, %arg2: memref<1x6x4xf32, #tpu.memory_space<vmem>>, %arg3: memref<1x6x2xf32, #tpu.memory_space<vmem>>, %arg4: memref<4x4xf32, #tpu.memory_space<vmem>>, %arg5: memref<1x4xf32, #tpu.memory_space<vmem>>, %arg6: memref<4x32xbf16, #tpu.memory_space<vmem>>, %arg7: memref<2x32xbf16, #tpu.memory_space<vmem>>, %arg8: memref<1x32xf32, #tpu.memory_space<vmem>>, %arg9: memref<32x32xbf16, #tpu.memory_space<vmem>>, %arg10: memref<1x32xf32, #tpu.memory_space<vmem>>, %arg11: memref<1x32xf32, #tpu.memory_space<vmem>>, %arg12: memref<1x1xf32, #tpu.memory_space<vmem>>, %arg13: memref<1x1x128xf32, #tpu.memory_space<vmem>>) attributes {dimension_semantics = [#tpu.dimension_semantics<parallel>], iteration_bounds = array<i64: 2>, scalar_prefetch = 0 : i64, scratch_operands = 0 : i64, tpu.core_type = #tpu.core_type<tc>, window_params = [{transform_indices = @transform_0, window_bounds = array<i64: 1, 6, 6>}, {transform_indices = @transform_1, window_bounds = array<i64: 1, 6, 4>}, {transform_indices = @transform_2, window_bounds = array<i64: 1, 6, 2>}, {pipeline_mode = #tpu.pipeline_mode<synchronous>, transform_indices = @transform_3, window_bounds = array<i64: 4, 4>}, {pipeline_mode = #tpu.pipeline_mode<synchronous>, transform_indices = @transform_4, window_bounds = array<i64: 1, 4>}, {pipeline_mode = #tpu.pipeline_mode<synchronous>, transform_indices = @transform_5, window_bounds = array<i64: 4, 32>}, {pipeline_mode = #tpu.pipeline_mode<synchronous>, transform_indices = @transform_6, window_bounds = array<i64: 2, 32>}, {pipeline_mode = #tpu.pipeline_mode<synchronous>, transform_indices = @transform_7, window_bounds = array<i64: 1, 32>}, {pipeline_mode = #tpu.pipeline_mode<synchronous>, transform_indices = @transform_8, window_bounds = array<i64: 32, 32>}, {pipeline_mode = #tpu.pipeline_mode<synchronous>, transform_indices = @transform_9, window_bounds = array<i64: 1, 32>}, {pipeline_mode = #tpu.pipeline_mode<synchronous>, transform_indices = @transform_10, window_bounds = array<i64: 1, 32>}, {pipeline_mode = #tpu.pipeline_mode<synchronous>, transform_indices = @transform_11, window_bounds = array<i64: 1, 1>}, {transform_indices = @transform_12, window_bounds = array<i64: 1, 1, 128>}]} {
    %c0 = arith.constant 0 : index
    %c0_0 = arith.constant 0 : index
    %c0_1 = arith.constant 0 : index
    %0 = vector.load %arg2[%c0, %c0_0, %c0_1] : memref<1x6x4xf32, #tpu.memory_space<vmem>>, vector<1x6x4xf32>
    %1 = vector.shape_cast %0 : vector<1x6x4xf32> to vector<6x4xf32>
    %c0_2 = arith.constant 0 : index
    %c0_3 = arith.constant 0 : index
    %c0_4 = arith.constant 0 : index
    %2 = vector.load %arg1[%c0_2, %c0_3, %c0_4] : memref<1x6x6xf32, #tpu.memory_space<vmem>>, vector<1x6x6xf32>
    %3 = vector.shape_cast %2 : vector<1x6x6xf32> to vector<6x6xf32>
    %c0_5 = arith.constant 0 : index
    %c0_6 = arith.constant 0 : index
    %c0_7 = arith.constant 0 : index
    %4 = vector.load %arg3[%c0_5, %c0_6, %c0_7] : memref<1x6x2xf32, #tpu.memory_space<vmem>>, vector<1x6x2xf32>
    %5 = vector.shape_cast %4 : vector<1x6x2xf32> to vector<6x2xf32>
    %c0_8 = arith.constant 0 : index
    %c0_9 = arith.constant 0 : index
    %6 = vector.load %arg4[%c0_8, %c0_9] : memref<4x4xf32, #tpu.memory_space<vmem>>, vector<4x4xf32>
    %7 = vector.extract_strided_slice %1 {offsets = [0, 0], sizes = [6, 1], strides = [1, 1]} : vector<6x4xf32> to vector<6x1xf32>
    %8 = vector.extract_strided_slice %6 {offsets = [0, 0], sizes = [1, 4], strides = [1, 1]} : vector<4x4xf32> to vector<1x4xf32>
    %9 = vector.broadcast %7 : vector<6x1xf32> to vector<6x4xf32>
    %10 = vector.broadcast %8 : vector<1x4xf32> to vector<6x4xf32>
    %11 = arith.mulf %9, %10 : vector<6x4xf32>
    %12 = vector.extract_strided_slice %1 {offsets = [0, 1], sizes = [6, 1], strides = [1, 1]} : vector<6x4xf32> to vector<6x1xf32>
    %13 = vector.extract_strided_slice %6 {offsets = [1, 0], sizes = [1, 4], strides = [1, 1]} : vector<4x4xf32> to vector<1x4xf32>
    %14 = vector.broadcast %12 : vector<6x1xf32> to vector<6x4xf32>
    %15 = vector.broadcast %13 : vector<1x4xf32> to vector<6x4xf32>
    %16 = arith.mulf %14, %15 : vector<6x4xf32>
    %17 = arith.addf %11, %16 : vector<6x4xf32>
    %18 = vector.extract_strided_slice %1 {offsets = [0, 2], sizes = [6, 1], strides = [1, 1]} : vector<6x4xf32> to vector<6x1xf32>
    %19 = vector.extract_strided_slice %6 {offsets = [2, 0], sizes = [1, 4], strides = [1, 1]} : vector<4x4xf32> to vector<1x4xf32>
    %20 = vector.broadcast %18 : vector<6x1xf32> to vector<6x4xf32>
    %21 = vector.broadcast %19 : vector<1x4xf32> to vector<6x4xf32>
    %22 = arith.mulf %20, %21 : vector<6x4xf32>
    %23 = arith.addf %17, %22 : vector<6x4xf32>
    %24 = vector.extract_strided_slice %1 {offsets = [0, 3], sizes = [6, 1], strides = [1, 1]} : vector<6x4xf32> to vector<6x1xf32>
    %25 = vector.extract_strided_slice %6 {offsets = [3, 0], sizes = [1, 4], strides = [1, 1]} : vector<4x4xf32> to vector<1x4xf32>
    %26 = vector.broadcast %24 : vector<6x1xf32> to vector<6x4xf32>
    %27 = vector.broadcast %25 : vector<1x4xf32> to vector<6x4xf32>
    %28 = arith.mulf %26, %27 : vector<6x4xf32>
    %29 = arith.addf %23, %28 : vector<6x4xf32>
    %30 = arith.truncf %3 : vector<6x6xf32> to vector<6x6xbf16>
    %31 = arith.truncf %29 : vector<6x4xf32> to vector<6x4xbf16>
    %cst = arith.constant dense<0.000000e+00> : vector<6x4xf32>
    %32 = tpu.matmul %30, %31, %cst {dimension_numbers = #tpu.dot_dimension_numbers<[1], [0], [0], [1], [0, 0, 1, 1], [], []>} : vector<6x6xbf16>, vector<6x4xbf16>, vector<6x4xf32> -> vector<6x4xf32>
    %c0_10 = arith.constant 0 : index
    %c0_11 = arith.constant 0 : index
    %33 = vector.load %arg5[%c0_10, %c0_11] : memref<1x4xf32, #tpu.memory_space<vmem>>, vector<1x4xf32>
    %34 = vector.broadcast %33 : vector<1x4xf32> to vector<6x4xf32>
    %35 = arith.addf %32, %34 : vector<6x4xf32>
    %cst_12 = arith.constant 0.000000e+00 : f32
    %36 = vector.broadcast %cst_12 : f32 to vector<6x4xf32>
    %37 = arith.maximumf %35, %36 : vector<6x4xf32>
    %38 = arith.addf %37, %1 : vector<6x4xf32>
    %39 = arith.truncf %38 : vector<6x4xf32> to vector<6x4xbf16>
    %c0_13 = arith.constant 0 : index
    %c0_14 = arith.constant 0 : index
    %40 = vector.load %arg6[%c0_13, %c0_14] : memref<4x32xbf16, #tpu.memory_space<vmem>>, vector<4x32xbf16>
    %cst_15 = arith.constant dense<0.000000e+00> : vector<6x32xf32>
    %41 = tpu.matmul %39, %40, %cst_15 {dimension_numbers = #tpu.dot_dimension_numbers<[1], [0], [0], [1], [0, 0, 1, 1], [], []>} : vector<6x4xbf16>, vector<4x32xbf16>, vector<6x32xf32> -> vector<6x32xf32>
    %42 = arith.truncf %5 : vector<6x2xf32> to vector<6x2xbf16>
    %c0_16 = arith.constant 0 : index
    %c0_17 = arith.constant 0 : index
    %43 = vector.load %arg7[%c0_16, %c0_17] : memref<2x32xbf16, #tpu.memory_space<vmem>>, vector<2x32xbf16>
    %cst_18 = arith.constant dense<0.000000e+00> : vector<6x32xf32>
    %44 = tpu.matmul %42, %43, %cst_18 {dimension_numbers = #tpu.dot_dimension_numbers<[1], [0], [0], [1], [0, 0, 1, 1], [], []>} : vector<6x2xbf16>, vector<2x32xbf16>, vector<6x32xf32> -> vector<6x32xf32>
    %45 = arith.addf %41, %44 : vector<6x32xf32>
    %c0_19 = arith.constant 0 : index
    %c0_20 = arith.constant 0 : index
    %46 = vector.load %arg8[%c0_19, %c0_20] : memref<1x32xf32, #tpu.memory_space<vmem>>, vector<1x32xf32>
    %47 = vector.broadcast %46 : vector<1x32xf32> to vector<6x32xf32>
    %48 = arith.addf %45, %47 : vector<6x32xf32>
    %cst_21 = arith.constant 0.000000e+00 : f32
    %49 = vector.broadcast %cst_21 : f32 to vector<6x32xf32>
    %50 = arith.maximumf %48, %49 : vector<6x32xf32>
    %51 = arith.truncf %50 : vector<6x32xf32> to vector<6x32xbf16>
    %c0_22 = arith.constant 0 : index
    %c0_23 = arith.constant 0 : index
    %52 = vector.load %arg9[%c0_22, %c0_23] : memref<32x32xbf16, #tpu.memory_space<vmem>>, vector<32x32xbf16>
    %cst_24 = arith.constant dense<0.000000e+00> : vector<6x32xf32>
    %53 = tpu.matmul %51, %52, %cst_24 {dimension_numbers = #tpu.dot_dimension_numbers<[1], [0], [0], [1], [0, 0, 1, 1], [], []>} : vector<6x32xbf16>, vector<32x32xbf16>, vector<6x32xf32> -> vector<6x32xf32>
    %c0_25 = arith.constant 0 : index
    %c0_26 = arith.constant 0 : index
    %54 = vector.load %arg10[%c0_25, %c0_26] : memref<1x32xf32, #tpu.memory_space<vmem>>, vector<1x32xf32>
    %55 = vector.broadcast %54 : vector<1x32xf32> to vector<6x32xf32>
    %56 = arith.addf %53, %55 : vector<6x32xf32>
    %cst_27 = arith.constant 0.000000e+00 : f32
    %57 = vector.broadcast %cst_27 : f32 to vector<6x32xf32>
    %58 = arith.maximumf %56, %57 : vector<6x32xf32>
    %cst_28 = arith.constant dense<0.000000e+00> : vector<32xf32>
    %59 = vector.multi_reduction <add>, %58, %cst_28 [0] : vector<6x32xf32> to vector<32xf32>
    %60 = vector.shape_cast %59 : vector<32xf32> to vector<1x32xf32>
    %c0_29 = arith.constant 0 : index
    %c0_30 = arith.constant 0 : index
    %61 = vector.load %arg11[%c0_29, %c0_30] : memref<1x32xf32, #tpu.memory_space<vmem>>, vector<1x32xf32>
    %62 = arith.mulf %60, %61 : vector<1x32xf32>
    %cst_31 = arith.constant dense<0.000000e+00> : vector<1xf32>
    %63 = vector.multi_reduction <add>, %62, %cst_31 [1] : vector<1x32xf32> to vector<1xf32>
    %64 = vector.shape_cast %63 : vector<1xf32> to vector<1x1xf32>
    %c0_32 = arith.constant 0 : index
    %c0_33 = arith.constant 0 : index
    %65 = vector.load %arg12[%c0_32, %c0_33] : memref<1x1xf32, #tpu.memory_space<vmem>>, vector<1x1xf32>
    %66 = arith.addf %64, %65 : vector<1x1xf32>
    %67 = vector.shape_cast %66 : vector<1x1xf32> to vector<1x1x1xf32>
    %68 = vector.shape_cast %67 : vector<1x1x1xf32> to vector<1x1x1xf32>
    %69 = vector.broadcast %68 : vector<1x1x1xf32> to vector<1x1x128xf32>
    %c0_34 = arith.constant 0 : index
    %c0_35 = arith.constant 0 : index
    %c0_36 = arith.constant 0 : index
    %70 = vector.load %arg13[%c0_34, %c0_35, %c0_36] : memref<1x1x128xf32, #tpu.memory_space<vmem>>, vector<1x1x128xf32>
    tpu.vector_store %arg13[%c0_34, %c0_35, %c0_36], %69 {strides = array<i32>} : memref<1x1x128xf32, #tpu.memory_space<vmem>>, vector<1x1x128xf32>,
    return
  }
  func.func @transform_0(%arg0: i32) -> (i32, i32, i32) {
    %c0_i32 = arith.constant 0 : i32
    %c0_i32_0 = arith.constant 0 : i32
    %c0_i32_1 = arith.constant 0 : i32
    return %arg0, %c0_i32, %c0_i32_0 : i32, i32, i32
  }
  func.func @transform_1(%arg0: i32) -> (i32, i32, i32) {
    %c0_i32 = arith.constant 0 : i32
    %c0_i32_0 = arith.constant 0 : i32
    %c0_i32_1 = arith.constant 0 : i32
    return %arg0, %c0_i32, %c0_i32_0 : i32, i32, i32
  }
  func.func @transform_2(%arg0: i32) -> (i32, i32, i32) {
    %c0_i32 = arith.constant 0 : i32
    %c0_i32_0 = arith.constant 0 : i32
    %c0_i32_1 = arith.constant 0 : i32
    return %arg0, %c0_i32, %c0_i32_0 : i32, i32, i32
  }
  func.func @transform_3(%arg0: i32) -> (i32, i32) {
    %c0_i32 = arith.constant 0 : i32
    %c0_i32_0 = arith.constant 0 : i32
    %c0_i32_1 = arith.constant 0 : i32
    return %c0_i32, %c0_i32_0 : i32, i32
  }
  func.func @transform_4(%arg0: i32) -> (i32, i32) {
    %c0_i32 = arith.constant 0 : i32
    %c0_i32_0 = arith.constant 0 : i32
    %c0_i32_1 = arith.constant 0 : i32
    return %c0_i32, %c0_i32_0 : i32, i32
  }
  func.func @transform_5(%arg0: i32) -> (i32, i32) {
    %c0_i32 = arith.constant 0 : i32
    %c0_i32_0 = arith.constant 0 : i32
    %c0_i32_1 = arith.constant 0 : i32
    return %c0_i32, %c0_i32_0 : i32, i32
  }
  func.func @transform_6(%arg0: i32) -> (i32, i32) {
    %c0_i32 = arith.constant 0 : i32
    %c0_i32_0 = arith.constant 0 : i32
    %c0_i32_1 = arith.constant 0 : i32
    return %c0_i32, %c0_i32_0 : i32, i32
  }
  func.func @transform_7(%arg0: i32) -> (i32, i32) {
    %c0_i32 = arith.constant 0 : i32
    %c0_i32_0 = arith.constant 0 : i32
    %c0_i32_1 = arith.constant 0 : i32
    return %c0_i32, %c0_i32_0 : i32, i32
  }
  func.func @transform_8(%arg0: i32) -> (i32, i32) {
    %c0_i32 = arith.constant 0 : i32
    %c0_i32_0 = arith.constant 0 : i32
    %c0_i32_1 = arith.constant 0 : i32
    return %c0_i32, %c0_i32_0 : i32, i32
  }
  func.func @transform_9(%arg0: i32) -> (i32, i32) {
    %c0_i32 = arith.constant 0 : i32
    %c0_i32_0 = arith.constant 0 : i32
    %c0_i32_1 = arith.constant 0 : i32
    return %c0_i32, %c0_i32_0 : i32, i32
  }
  func.func @transform_10(%arg0: i32) -> (i32, i32) {
    %c0_i32 = arith.constant 0 : i32
    %c0_i32_0 = arith.constant 0 : i32
    %c0_i32_1 = arith.constant 0 : i32
    return %c0_i32, %c0_i32_0 : i32, i32
  }
  func.func @transform_11(%arg0: i32) -> (i32, i32) {
    %c0_i32 = arith.constant 0 : i32
    %c0_i32_0 = arith.constant 0 : i32
    %c0_i32_1 = arith.constant 0 : i32
    return %c0_i32, %c0_i32_0 : i32, i32
  }
  func.func @transform_12(%arg0: i32) -> (i32, i32, i32) {
    %c0_i32 = arith.constant 0 : i32
    %c0_i32_0 = arith.constant 0 : i32
    %c0_i32_1 = arith.constant 0 : i32
    return %arg0, %c0_i32, %c0_i32_0 : i32, i32, i32
  }
}

</mosaic_0001>

<bundles_post_ra>
// kernel: tpu_custom_call.1
= control target key start
LH: loop header
LB: loop body
LE: loop exit
PB: predicated region body
PF: predicated region fallthrough
CT: control target
= control target key end

     0   :  { %s1045_s0 = inlined_call_operand.vmem [shape: f32[2,6,6], index: 0, kind: input, shape index: {}]   ;;  %s1046_s1 = inlined_call_operand.vmem [shape: f32[2,6,4], index: 1, kind: input, shape index: {}]   ;;  %s1047_s2 = inlined_call_operand.vmem [shape: f32[2,6,2], index: 2, kind: input, shape index: {}]   ;;  %s1048_s3 = inlined_call_operand.vmem [shape: f32[4,4], index: 3, kind: input, shape index: {}]   ;;  %s1049_s4 = inlined_call_operand.vmem [shape: f32[1,4], index: 4, kind: input, shape index: {}]   ;;  %s1050_s5 = inlined_call_operand.vmem [shape: bf16[4,32], index: 5, kind: input, shape index: {}]   ;;  %s1051_s6 = inlined_call_operand.vmem [shape: bf16[2,32], index: 6, kind: input, shape index: {}]   ;;  %s1052_s7 = inlined_call_operand.vmem [shape: f32[1,32], index: 7, kind: input, shape index: {}]   ;;  %s1053_s8 = inlined_call_operand.vmem [shape: bf16[32,32], index: 8, kind: input, shape index: {}]   ;;  %s1054_s9 = inlined_call_operand.vmem [shape: f32[1,32], index: 9, kind: input, shape index: {}]   ;;  %s1055_s10 = inlined_call_operand.vmem [shape: f32[1,32], index: 10, kind: input, shape index: {}]   ;;  %s1056_s11 = inlined_call_operand.<no memory space> [shape: f32[1,1], index: 11, kind: input, shape index: {}]   ;;  %s1057_s12 = inlined_call_operand.hbm [shape: f32[2,1,128], index: 12, kind: output, shape index: {}]  }
   0x1   :  { %1058 = sst [smem:[#allocation6_spill]] %s1045_s0  ;;  %v17_v0 = vstv %s1056_s11 }
   0x2   :  { %1059 = sst [smem:[#allocation7_spill]] %s1046_s1  ;;  %18 = vst [vmem:[#allocation2] sm:$0x1] %v17_v0 }
   0x3   :  { %19 = vsyncpa [#allocation4], 0 }
   0x4   :  { %21 = vsyncpa [#allocation4 + $0x1], 0  ;;  %s922_s23 = smov 0   ;;  %s924_s24 = smov 0  }
   0x5   :  { %s926_s25 = smov 0   ;;  %s928_s26 = smov 0  }
   0x6 LB: > { %s943_s11 = sadd.s32 4294967295, %s848_s26   ;;  %s711_s27 = sadd.s32 4294967294, %s848_s26   ;;  %s848_s26 = sphi %s928_s26, %s1067_s26   ;;  %s844_s25 = sphi %s926_s25, %s1066_s25   ;;  %s840_s24 = sphi %s924_s24, %s1065_s24   ;;  %s836_s23 = sphi %s922_s23, %s1064_s23  }
   0x7   : > { %s947_s28 = sadd.s32 1, %s848_s26   ;;  %s301_s29 = sadd.s32 1, %s844_s25 }
   0x8   : > { %s298_s30 = ssub.s32 %s848_s26, %s947_s28  ;;  %p311_p0 = scmp.ne.s32.totalorder %s844_s25, %s840_s24 }
   0x9   : > { %p299_p1 = scmp.eq.s32.totalorder %s298_s30, 0  ;;  %p312_p2 = scmp.eq.s32.totalorder %s943_s11, 1 }
   0xa   : > { %p317_p3 = scmp.ne.s32.totalorder %s840_s24, %s836_s23  ;;  %p318_p4 = scmp.eq.s32.totalorder %s711_s27, 1 }
   0xb   : > { %s958_s13 = scalar_select %p299_p1, %s844_s25, %s301_s29  }
   0xc   : > { %p960_p5 = por %p312_p2, %p311_p0  ;;  %p964_p6 = por %p318_p4, %p317_p3 }
   0xd   : > { %p714_p7 = scmp.ge.s32.totalorder %s848_s26, 1  ;;  %p384_p8 = scmp.lt.s32.totalorder %s848_s26, 3 }
   0xf   : > { %p385_p9 = pnand %p714_p7, %p384_p8 }
  0x10   : > { %p432_p10 = scmp.lt.s32.totalorder (!%p385_p9), %s943_s11, 1  ;;  %s1062_s1 = sld [smem:[#allocation7_spill]] (!%p385_p9) }
  0x11   : > { %388 = sbr.rel (%p385_p9) target bundleno = 803 (0x323), region = 68  ;;  %s1063_s0 = sld [smem:[#allocation6_spill]] (!%p385_p9) }
  0x16   : > { %v850_v1 = vmov 0   ;;  %v851_v2 = vmov 2   ;;  %s433_s16 = scalar_select %p432_p10, %s943_s11, 1  ;;  %v852_v4 = vmov 1   ;;  %v853_v5 = vmov 3   ;;  %v733_v41 = vld [vmem:[%s1053_s8 + $0x8] sm:$0xff] }
  0x17   : > { %777 = vset.pattern.permute.xlu0 %v850_v1  ;;  %779 = vset.pattern.permute.xlu1 %v851_v2  ;;  %v448_v8 = vld [vmem:[%s1048_s3] sm:$0xf]  ;;  %vm487_vm0 = vcmask 1042432   ;;  %vm483_vm1 = vcmask 48128   ;;  %vm514_vm2 = vcmask 1040384   ;;  %vm535_vm3 = vcmask 1041408  }
  0x18   : > { %781 = vset.pattern.permute.xlu2 %v850_v1  ;;  %s972_s17 = sshll.u32 %s433_s16, 3  ;;  %v454_v9 = vperm.slane %v448_v8, 0  ;;  %v460_v10 = vperm.slane %v448_v8, 1  ;;  %v467_v11 = vperm.slane %v448_v8, 2  ;;  %v474_v12 = vperm.slane %v448_v8, 3  ;;  %589 = vmatpush.bf16.msra.mxu3 %v733_v41  ;;  %v732_v42 = vld [vmem:[%s1053_s8] sm:$0xff] }
  0x19   : > { %s439_s20 = scalar_lea.vmem %s1062_s1, %s972_s17  ;;  %s435_s30 = scalar_lea.vmem %s1063_s0, %s972_s17  ;;  %v509_v26 = vld [vmem:[%s1051_s6] sm:$0x1]  ;;  %vm510_vm4 = vcmask 15360   ;;  %vm531_vm5 = vcmask 31744   ;;  %vm579_vm6 = vcmask 261120   ;;  %vm597_vm7 = vcmask 259072  }
  0x1a   : > { %v445_v3 = vld [vmem:[%s439_s20] sm:$0x3f]  ;;  %s443_s19 = scalar_lea.vmem %s1047_s2, %s972_s17  ;;  %v516_v27 = vsel %vm514_vm2, %v509_v26, 0  ;;  %vm607_vm8 = vcmask 253952   ;;  %s806_s16 = scalar_lea.hbm %s1057_s12, 2 }
  0x1b   : > { %451 = vperm.xlu0 %777, %v445_v3   ;;  %464 = vperm.xlu1 %779, %v445_v3   ;;  %v446_v22 = vld [vmem:[%s435_s30] sm:$0x3f]  ;;  %s430_s30 = sand.u32 1, %s840_s24  }
  0x1c   : > { %v477_v25 = vpack.c.bf16 %v446_v22, %v446_v22  ;;  %525 = vmatpush.bf16.msra.mxu1 %v516_v27  ;;  %v507_v28 = vld [vmem:[%s1050_s5] sm:$0x3]  ;;  %590 = vmatpush.bf16.msra.mxu3 %v732_v42  ;;  %s431_s20 = scalar_lea.vmem [#allocation3], %s430_s30  ;;  %s620_s27 = scalar_lea.sflag [#allocation4], %s430_s30 }
  0x1d   : > { %v447_v29 = vld [vmem:[%s443_s19] sm:$0x3f]  ;;  %v537_v30 = vsel %vm535_vm3, %v507_v28, 0  ;;  %s628_s19 = scalar_lea.hbm %s1057_s12, %s943_s11  ;;  %s630_s21 = sshll.u32 %s431_s20, 4  ;;  %s631_s21 = int_to_ptr.vmem [resolvable:$true] %s630_s21 }
  0x1e   : > { %v508_v31 = vpack.c.bf16 %v447_v29, %v447_v29  ;;  %546 = vmatpush.bf16.msra.mxu2 %v537_v30  ;;  %v783_v32 = vld [vmem:[%s1049_s4] ss:$0 sm:$0xff]  ;;  %s632_s22 = sshll.u32 %s628_s19, 4  ;;  %s633_s22 = int_to_ptr.hbm [resolvable:$true] %s632_s22 }
  0x1f   : > { %v784_v43 = vld [vmem:[%s1052_s7] ss:$0 sm:$0xff]  ;;  %s800_s29 = sshra.s32 %s633_s22, 4  ;;  %s801_s29 = int_to_ptr.hbm [resolvable:$true] %s800_s29 }
  0x20   : > { %719 = vmatmul.msk.bf16.vlgmr.msra.gmra.mxu1 %vm510_vm4, %v508_v31  ;;  %v785_v50 = vld [vmem:[%s1054_s9] ss:$0 sm:$0xff]  ;;  %s802_s17 = scalar_lea.hbm %s801_s29, 1  ;;  %p807_p0 = scmp.lt.s32.totalorder %s801_s29, %s1057_s12 }
  0x21   : > { %v605_v61 = vld [vmem:[%s1055_s10] sm:$0x1]  ;;  %p803_p11 = scmp.ne.s32.totalorder %s801_s29, %s802_s17  ;;  %p808_p1 = scmp.lt.s32.totalorder %s806_s16, %s802_s17 }
  0x23   : > { %778 = vset.pattern.permute.xlu0 %v852_v4  ;;  %780 = vset.pattern.permute.xlu1 %v853_v5  ;;  %p804_p12 = pnand %p803_p11, %p960_p5  ;;  %p809_p2 = por %p808_p1, %p807_p0 }
  0x24   : > { %457 = vperm.xlu0 %778, %v445_v3   ;;  %471 = vperm.xlu1 %780, %v445_v3  }
  0x25   : > { %p805_p13 = pneg %p804_p12 }
  0x27   : > { %p810_p3 = pnand %p809_p2, %p805_p13 }
  0x2c   : > { %782 = vset.pattern.permute.xlu0 %v850_v1  ;;  %v611_v1 = vld [vmem:[#allocation2] sm:$0x1] }
  0x8d   : > { %v452_v6 = vpop.permute.xlu0 %451  ;;  %v465_v7 = vpop.permute.xlu1 %464 }
  0x8e   : > { %v455_v15 = vmul.f32 %v454_v9, %v452_v6  ;;  %v468_v17 = vmul.f32 %v467_v11, %v465_v7 }
  0x96   : > { %v458_v13 = vpop.permute.xlu0 %457  ;;  %v472_v14 = vpop.permute.xlu1 %471 }
  0x97   : > { %v461_v16 = vmul.f32 %v460_v10, %v458_v13  ;;  %v475_v19 = vmul.f32 %v474_v12, %v472_v14 }
  0x99   : > { %v462_v18 = vadd.f32 %v461_v16, %v455_v15 }
  0x9b   : > { %v469_v20 = vadd.f32 %v468_v17, %v462_v18 }
  0x9d   : > { %v476_v21 = vadd.f32 %v475_v19, %v469_v20  ;;  %v527_v39 = vpop.f32.mrf.mxu1 }
  0x9f   : > { %v478_v23 = vpack.c.bf16 %v476_v21, %v476_v21 }
  0xa1   : > { %v489_v24 = vsel %vm487_vm0, %v478_v23, 0 }
  0xa2   : > { %498 = vmatpush.bf16.msra.mxu0 %v489_v24 }
  0xa5   : > { %718 = vmatmul.msk.bf16.vlgmr.msra.gmra.mxu0 %vm483_vm1, %v477_v25  ;;  %v529_v40 = vpop.f32.mrf.mxu1 }
 0x122   : > { %v500_v33 = vpop.f32.mrf.mxu0 }
 0x123   : > { %v501_v34 = vadd.f32 %v783_v32, %v500_v33 }
 0x125   : > { %v504_v35 = vmax.f32 %v501_v34, 0.0 }
 0x127   : > { %v505_v36 = vadd.f32 %v504_v35, %v445_v3 }
 0x129   : > { %v506_v37 = vpack.c.bf16 %v505_v36, %v505_v36 }
 0x12a   : > { %v502_v38 = vpop.f32.mrf.mxu0 }
 0x12b   : > { %720 = vmatmul.msk.bf16.vlgmr.msra.gmra.mxu2 %vm531_vm5, %v506_v37 }
 0x1ae   : > { %v548_v44 = vpop.f32.mrf.mxu2 }
 0x1af   : > { %v549_v45 = vadd.f32 %v548_v44, %v527_v39 }
 0x1b1   : > { %v556_v46 = vadd.f32 %v784_v43, %v549_v45 }
 0x1b3   : > { %v557_v47 = vmax.f32 %v556_v46, 0.0 }
 0x1b5   : > { %v558_v48 = vpack.c.bf16 %v557_v47, %v557_v47 }
 0x1b6   : > { %v550_v49 = vpop.f32.mrf.mxu2 }
 0x1b7   : > { %729 = vmatmul.msk.bf16.vlgmr.msra.gmra.mxu3 %vm579_vm6, %v558_v48 }
 0x23a   : > { %v592_v51 = vpop.f32.mrf.mxu3 }
 0x23b   : > { %v593_v52 = vadd.f32 %v785_v50, %v592_v51 }
 0x23d   : > { %v596_v53 = vmax.f32 %v593_v52, 0.0 }
 0x23f   : > { %v598_v54 = vsel %vm597_vm7, %v596_v53, 0.0 }
 0x240   : > { %v599_v55 = vrot.slane %v598_v54, 4 }
 0x242   : > { %v600_v56 = vadd.f32 %v599_v55, %v598_v54  ;;  %v594_v57 = vpop.f32.mrf.mxu3 }
 0x244   : > { %v601_v58 = vrot.slane %v600_v56, 2 }
 0x246   : > { %v602_v59 = vadd.f32 %v601_v58, %v600_v56 }
 0x248   : > { %v603_v60 = vrot.slane %v602_v59, 1 }
 0x24a   : > { %v604_v62 = vadd.f32 %v603_v60, %v602_v59 }
 0x24c   : > { %v606_v63 = vmul.f32 %v605_v61, %v604_v62 }
 0x24e   : > { %v608_v0 = vsel %vm607_vm8, %v606_v63, 0.0 }
 0x24f   : > { %609 = vadd.xlane.f32.xlu2 %v608_v0 }
 0x2c2   : > { %v610_v2 = vpop.xlane.xlu2 %609 }
 0x2c3   : > { %v612_v3 = vadd.f32 %v611_v1, %v610_v2 }
 0x2c5   : > { %615 = vperm.xlu2 %781, %v612_v3  }
 0x31f   : > { %v616_v4 = vpop.permute.xlu2 %615 }
 0x320   : > { %618 = vst [vmem:[%s431_s20] sm:$0x1] %v616_v4 }
 0x321   : > { %813 = shalt.err (!%p810_p3)
}
 0x322   : > { %734 = dma.vmem_to_hbm [thread:$0]  (%p960_p5), %s631_s21, 16, %s633_s22, %s620_s27  }
 0x323 PF: > { %p740_p4 = scmp.ge.s32.totalorder %s848_s26, 2  ;;  %s644_s30 = sand.u32 1, %s836_s23  }
 0x324   : > { %s645_s0 = scalar_lea.sflag [#allocation4], %s644_s30 }
 0x325   : > { %p737_p7 = pnand %p740_p4, %p964_p6 }
 0x327   : > { %p738_p8 = pneg %p737_p7 }
 0x329   : > { %831 = dma.done.wait (%p738_p8), %s645_s0, 16  }
 0x32a   : > { %833 = vsyncadd (%p738_p8), %s645_s0, 4294967280  ;;  %p24_p9 = scmp.ge.s32.totalorder %s947_s28, 4   ;;  %s1064_s23 = smov %s840_s24 }
 0x32b   : > { %s1065_s24 = smov %s844_s25  ;;  %s1066_s25 = smov %s958_s13 }
 0x32c   : > { %s1067_s26 = smov %s947_s28  ;;  %26 = sbr.rel (!%p24_p9) target bundleno = 6 (0x6), region = 109 }
 0x331   :  { %650 = vsyncpa [#allocation4], 1 }
 0x332   :  { %652 = vsyncpa [#allocation4 + $0x1], 1 }

</bundles_post_ra>
